<compile_context>
chip_gen: v5e
topology: v5e:2x2
jax: 0.10.0
libtpu: 0.0.40
codegen_flags: <defaults>
</compile_context>

<pallas_src>
import jax
import jax.numpy as jnp
from jax.experimental import pallas as pl
from jax.experimental.pallas import tpu as pltpu


HIDDEN = 256
NUM_CLASSES = 2
PAD_OUT = 128          # lane-dense classifier width (real logits live in [:, :2])
TM_MAX = 1024          # batch tile: multiple of 256 (v6e/v7x MXU) and 128 (v5e)


def _round_up(n, m):
    return ((n + m - 1) // m) * m


def _mlp_kernel(x_ref,
                w1_ref, b1_ref,
                w2_ref, b2_ref,
                w3_ref, b3_ref,
                w4_ref, b4_ref,
                o_ref):
    # x: [TM, 6] f32
    x = x_ref[...]
    w1 = w1_ref[...]                       # [6, 256] f32

    # ---- Layer 1: Linear(6, 256) as 6 unrolled VPU broadcast-FMAs (skip MXU) ----
    h = b1_ref[...] + x[:, 0:1] * w1[0:1, :]
    for k in range(1, 6):                  # static unroll, K = 6
        h = h + x[:, k:k + 1] * w1[k:k + 1, :]
    h = jnp.maximum(h, 0.0)                # f32 ReLU on VPU

    # ---- Layer 2: Linear(256, 256), bf16 MXU matmul with f32 accumulation ----
    h = jnp.dot(h.astype(jnp.bfloat16), w2_ref[...],
                preferred_element_type=jnp.float32) + b2_ref[...]
    h = jnp.maximum(h, 0.0)

    # ---- Layer 3: Linear(256, 256) ----
    h = jnp.dot(h.astype(jnp.bfloat16), w3_ref[...],
                preferred_element_type=jnp.float32) + b3_ref[...]
    h = jnp.maximum(h, 0.0)

    # ---- Classifier: Linear(256, 2), padded to 128 lanes for a dense store ----
    y = jnp.dot(h.astype(jnp.bfloat16), w4_ref[...],
                preferred_element_type=jnp.float32) + b4_ref[...]
    o_ref[...] = y.astype(o_ref.dtype)


def new_net_forward(x, params):
    """x: [B, 6] float32 -> logits [B, 2] float32."""
    (w1, b1), (w2, b2), (w3, b3), (w4, b4) = params
    B = x.shape[0]
    H = w1.shape[1]                         # 256
    C = w4.shape[1]                         # 2

    # Batch tile: multiple of 8 (sublane), multiple of 256 when large, capped
    # so the working set stays comfortably inside v7x's VMEM budget.
    TM = min(TM_MAX, _round_up(B, 8))
    grid = (pl.cdiv(B, TM),)

    # bf16 weights for the 256-wide matmuls (accumulation stays f32 in-kernel).
    w2b = w2.astype(jnp.bfloat16)
    w3b = w3.astype(jnp.bfloat16)
    # Zero-pad classifier to 128 output lanes.
    w4p = jnp.zeros((H, PAD_OUT), jnp.bfloat16).at[:, :C].set(w4.astype(jnp.bfloat16))
    b4p = jnp.zeros((1, PAD_OUT), jnp.float32).at[:, :C].set(b4)

    # Weights/biases: full-array blocks, constant index_map -> resident in VMEM.
    resident = lambda a: pl.BlockSpec(a.shape, lambda i: (0,) * a.ndim)

    flops = 2 * B * (6 * H + H * H + H * H + H * C)
    bytes_accessed = (4 * B * 6                      # x in
                      + 4 * B * PAD_OUT              # padded out
                      + 6 * H * 4                    # w1 f32
                      + 2 * (H * H * 2)              # w2, w3 bf16
                      + H * PAD_OUT * 2              # w4 padded bf16
                      + 4 * (3 * H + PAD_OUT))       # biases f32

    out = pl.pallas_call(
        _mlp_kernel,
        out_shape=jax.ShapeDtypeStruct((B, PAD_OUT), jnp.float32),
        grid=grid,
        in_specs=[pl.BlockSpec((TM, 6), lambda i: (i, 0)),
                  resident(w1), resident(b1),
                  resident(w2b), resident(b2),
                  resident(w3b), resident(b3),
                  resident(w4p), resident(b4p)],
        out_specs=pl.BlockSpec((TM, PAD_OUT), lambda i: (i, 0)),
        compiler_params=pltpu.CompilerParams(
            dimension_semantics=("parallel",),
            vmem_limit_bytes=32 * 1024 * 1024),
        cost_estimate=pl.CostEstimate(flops=flops, transcendentals=0,
                                      bytes_accessed=bytes_accessed),
    )(x, w1, b1, w2b, b2, w3b, b3, w4p, b4p)

    return out[:, :C]


def init_params(key):
    """Deterministic init mimicking PyTorch's default Linear init:
    U(-1/sqrt(fan_in), 1/sqrt(fan_in)) for both weight and bias.
    Weights stored as [in, out] so the kernel computes y = x @ W + b."""
    def linear(key, fan_in, fan_out):
        kw, kb = jax.random.split(key)
        bound = 1.0 / (fan_in ** 0.5)
        w = jax.random.uniform(kw, (fan_in, fan_out), jnp.float32, -bound, bound)
        b = jax.random.uniform(kb, (1, fan_out), jnp.float32, -bound, bound)
        return w, b

    k1, k2, k3, k4 = jax.random.split(key, 4)
    return (linear(k1, 6, HIDDEN),
            linear(k2, HIDDEN, HIDDEN),
            linear(k3, HIDDEN, HIDDEN),
            linear(k4, HIDDEN, NUM_CLASSES))


def _reference_forward(x, params):
    """Pure-JAX reference matching the kernel's precision path
    (f32 layer 1, bf16 operands + f32 accumulation for the 256-wide matmuls)."""
    (w1, b1), (w2, b2), (w3, b3), (w4, b4) = params
    h = jnp.maximum(x @ w1 + b1, 0.0)
    h = jnp.maximum(jnp.dot(h.astype(jnp.bfloat16), w2.astype(jnp.bfloat16),
                            preferred_element_type=jnp.float32) + b2, 0.0)
    h = jnp.maximum(jnp.dot(h.astype(jnp.bfloat16), w3.astype(jnp.bfloat16),
                            preferred_element_type=jnp.float32) + b3, 0.0)
    return jnp.dot(h.astype(jnp.bfloat16), w4.astype(jnp.bfloat16),
                   preferred_element_type=jnp.float32) + b4


if __name__ == "__main__":
    key = jax.random.PRNGKey(0)
    kx, kp = jax.random.split(key)

    batch = 8
    x = jax.random.normal(kx, (batch, 6), dtype=jnp.float32)
    params = init_params(kp)

    out = new_net_forward(x, params)
    out = jax.block_until_ready(out)

    ref = _reference_forward(x, params)
    assert out.shape == (batch, NUM_CLASSES)
    assert jnp.allclose(out, ref, atol=1e-2, rtol=1e-2), "mismatch vs reference"

    print("KERNEL_OK")
</pallas_src>

<mosaic_0001>
module attributes {stable_mosaic.version = 11 : i64} {
  func.func @_mlp_kernel(%arg0: i32, %arg1: memref<8x6xf32, #tpu.memory_space<vmem>>, %arg2: memref<6x256xf32, #tpu.memory_space<vmem>>, %arg3: memref<1x256xf32, #tpu.memory_space<vmem>>, %arg4: memref<256x256xbf16, #tpu.memory_space<vmem>>, %arg5: memref<1x256xf32, #tpu.memory_space<vmem>>, %arg6: memref<256x256xbf16, #tpu.memory_space<vmem>>, %arg7: memref<1x256xf32, #tpu.memory_space<vmem>>, %arg8: memref<256x128xbf16, #tpu.memory_space<vmem>>, %arg9: memref<1x128xf32, #tpu.memory_space<vmem>>, %arg10: memref<8x128xf32, #tpu.memory_space<vmem>>) attributes {dimension_semantics = [#tpu.dimension_semantics<parallel>], iteration_bounds = array<i64: 1>, scalar_prefetch = 0 : i64, scratch_operands = 0 : i64, tpu.core_type = #tpu.core_type<tc>, window_params = [{transform_indices = @transform_0, window_bounds = array<i64: 8, 6>}, {pipeline_mode = #tpu.pipeline_mode<synchronous>, transform_indices = @transform_1, window_bounds = array<i64: 6, 256>}, {pipeline_mode = #tpu.pipeline_mode<synchronous>, transform_indices = @transform_2, window_bounds = array<i64: 1, 256>}, {pipeline_mode = #tpu.pipeline_mode<synchronous>, transform_indices = @transform_3, window_bounds = array<i64: 256, 256>}, {pipeline_mode = #tpu.pipeline_mode<synchronous>, transform_indices = @transform_4, window_bounds = array<i64: 1, 256>}, {pipeline_mode = #tpu.pipeline_mode<synchronous>, transform_indices = @transform_5, window_bounds = array<i64: 256, 256>}, {pipeline_mode = #tpu.pipeline_mode<synchronous>, transform_indices = @transform_6, window_bounds = array<i64: 1, 256>}, {pipeline_mode = #tpu.pipeline_mode<synchronous>, transform_indices = @transform_7, window_bounds = array<i64: 256, 128>}, {pipeline_mode = #tpu.pipeline_mode<synchronous>, transform_indices = @transform_8, window_bounds = array<i64: 1, 128>}, {transform_indices = @transform_9, window_bounds = array<i64: 8, 128>}]} {
    %c0 = arith.constant 0 : index
    %c0_0 = arith.constant 0 : index
    %0 = vector.load %arg1[%c0, %c0_0] : memref<8x6xf32, #tpu.memory_space<vmem>>, vector<8x6xf32>
    %c0_1 = arith.constant 0 : index
    %c0_2 = arith.constant 0 : index
    %1 = vector.load %arg2[%c0_1, %c0_2] : memref<6x256xf32, #tpu.memory_space<vmem>>, vector<6x256xf32>
    %c0_3 = arith.constant 0 : index
    %c0_4 = arith.constant 0 : index
    %2 = vector.load %arg3[%c0_3, %c0_4] : memref<1x256xf32, #tpu.memory_space<vmem>>, vector<1x256xf32>
    %3 = vector.extract_strided_slice %0 {offsets = [0, 0], sizes = [8, 1], strides = [1, 1]} : vector<8x6xf32> to vector<8x1xf32>
    %4 = vector.extract_strided_slice %1 {offsets = [0, 0], sizes = [1, 256], strides = [1, 1]} : vector<6x256xf32> to vector<1x256xf32>
    %5 = vector.broadcast %3 : vector<8x1xf32> to vector<8x256xf32>
    %6 = vector.broadcast %4 : vector<1x256xf32> to vector<8x256xf32>
    %7 = arith.mulf %5, %6 : vector<8x256xf32>
    %8 = vector.broadcast %2 : vector<1x256xf32> to vector<8x256xf32>
    %9 = arith.addf %8, %7 : vector<8x256xf32>
    %10 = vector.extract_strided_slice %0 {offsets = [0, 1], sizes = [8, 1], strides = [1, 1]} : vector<8x6xf32> to vector<8x1xf32>
    %11 = vector.extract_strided_slice %1 {offsets = [1, 0], sizes = [1, 256], strides = [1, 1]} : vector<6x256xf32> to vector<1x256xf32>
    %12 = vector.broadcast %10 : vector<8x1xf32> to vector<8x256xf32>
    %13 = vector.broadcast %11 : vector<1x256xf32> to vector<8x256xf32>
    %14 = arith.mulf %12, %13 : vector<8x256xf32>
    %15 = arith.addf %9, %14 : vector<8x256xf32>
    %16 = vector.extract_strided_slice %0 {offsets = [0, 2], sizes = [8, 1], strides = [1, 1]} : vector<8x6xf32> to vector<8x1xf32>
    %17 = vector.extract_strided_slice %1 {offsets = [2, 0], sizes = [1, 256], strides = [1, 1]} : vector<6x256xf32> to vector<1x256xf32>
    %18 = vector.broadcast %16 : vector<8x1xf32> to vector<8x256xf32>
    %19 = vector.broadcast %17 : vector<1x256xf32> to vector<8x256xf32>
    %20 = arith.mulf %18, %19 : vector<8x256xf32>
    %21 = arith.addf %15, %20 : vector<8x256xf32>
    %22 = vector.extract_strided_slice %0 {offsets = [0, 3], sizes = [8, 1], strides = [1, 1]} : vector<8x6xf32> to vector<8x1xf32>
    %23 = vector.extract_strided_slice %1 {offsets = [3, 0], sizes = [1, 256], strides = [1, 1]} : vector<6x256xf32> to vector<1x256xf32>
    %24 = vector.broadcast %22 : vector<8x1xf32> to vector<8x256xf32>
    %25 = vector.broadcast %23 : vector<1x256xf32> to vector<8x256xf32>
    %26 = arith.mulf %24, %25 : vector<8x256xf32>
    %27 = arith.addf %21, %26 : vector<8x256xf32>
    %28 = vector.extract_strided_slice %0 {offsets = [0, 4], sizes = [8, 1], strides = [1, 1]} : vector<8x6xf32> to vector<8x1xf32>
    %29 = vector.extract_strided_slice %1 {offsets = [4, 0], sizes = [1, 256], strides = [1, 1]} : vector<6x256xf32> to vector<1x256xf32>
    %30 = vector.broadcast %28 : vector<8x1xf32> to vector<8x256xf32>
    %31 = vector.broadcast %29 : vector<1x256xf32> to vector<8x256xf32>
    %32 = arith.mulf %30, %31 : vector<8x256xf32>
    %33 = arith.addf %27, %32 : vector<8x256xf32>
    %34 = vector.extract_strided_slice %0 {offsets = [0, 5], sizes = [8, 1], strides = [1, 1]} : vector<8x6xf32> to vector<8x1xf32>
    %35 = vector.extract_strided_slice %1 {offsets = [5, 0], sizes = [1, 256], strides = [1, 1]} : vector<6x256xf32> to vector<1x256xf32>
    %36 = vector.broadcast %34 : vector<8x1xf32> to vector<8x256xf32>
    %37 = vector.broadcast %35 : vector<1x256xf32> to vector<8x256xf32>
    %38 = arith.mulf %36, %37 : vector<8x256xf32>
    %39 = arith.addf %33, %38 : vector<8x256xf32>
    %cst = arith.constant 0.000000e+00 : f32
    %40 = vector.broadcast %cst : f32 to vector<8x256xf32>
    %41 = arith.maximumf %39, %40 : vector<8x256xf32>
    %42 = arith.truncf %41 : vector<8x256xf32> to vector<8x256xbf16>
    %c0_5 = arith.constant 0 : index
    %c0_6 = arith.constant 0 : index
    %43 = vector.load %arg4[%c0_5, %c0_6] : memref<256x256xbf16, #tpu.memory_space<vmem>>, vector<256x256xbf16>
    %cst_7 = arith.constant dense<0.000000e+00> : vector<8x256xf32>
    %44 = tpu.matmul %42, %43, %cst_7 {dimension_numbers = #tpu.dot_dimension_numbers<[1], [0], [0], [1], [0, 0, 1, 1], [], []>} : vector<8x256xbf16>, vector<256x256xbf16>, vector<8x256xf32> -> vector<8x256xf32>
    %c0_8 = arith.constant 0 : index
    %c0_9 = arith.constant 0 : index
    %45 = vector.load %arg5[%c0_8, %c0_9] : memref<1x256xf32, #tpu.memory_space<vmem>>, vector<1x256xf32>
    %46 = vector.broadcast %45 : vector<1x256xf32> to vector<8x256xf32>
    %47 = arith.addf %44, %46 : vector<8x256xf32>
    %cst_10 = arith.constant 0.000000e+00 : f32
    %48 = vector.broadcast %cst_10 : f32 to vector<8x256xf32>
    %49 = arith.maximumf %47, %48 : vector<8x256xf32>
    %50 = arith.truncf %49 : vector<8x256xf32> to vector<8x256xbf16>
    %c0_11 = arith.constant 0 : index
    %c0_12 = arith.constant 0 : index
    %51 = vector.load %arg6[%c0_11, %c0_12] : memref<256x256xbf16, #tpu.memory_space<vmem>>, vector<256x256xbf16>
    %cst_13 = arith.constant dense<0.000000e+00> : vector<8x256xf32>
    %52 = tpu.matmul %50, %51, %cst_13 {dimension_numbers = #tpu.dot_dimension_numbers<[1], [0], [0], [1], [0, 0, 1, 1], [], []>} : vector<8x256xbf16>, vector<256x256xbf16>, vector<8x256xf32> -> vector<8x256xf32>
    %c0_14 = arith.constant 0 : index
    %c0_15 = arith.constant 0 : index
    %53 = vector.load %arg7[%c0_14, %c0_15] : memref<1x256xf32, #tpu.memory_space<vmem>>, vector<1x256xf32>
    %54 = vector.broadcast %53 : vector<1x256xf32> to vector<8x256xf32>
    %55 = arith.addf %52, %54 : vector<8x256xf32>
    %cst_16 = arith.constant 0.000000e+00 : f32
    %56 = vector.broadcast %cst_16 : f32 to vector<8x256xf32>
    %57 = arith.maximumf %55, %56 : vector<8x256xf32>
    %58 = arith.truncf %57 : vector<8x256xf32> to vector<8x256xbf16>
    %c0_17 = arith.constant 0 : index
    %c0_18 = arith.constant 0 : index
    %59 = vector.load %arg8[%c0_17, %c0_18] : memref<256x128xbf16, #tpu.memory_space<vmem>>, vector<256x128xbf16>
    %cst_19 = arith.constant dense<0.000000e+00> : vector<8x128xf32>
    %60 = tpu.matmul %58, %59, %cst_19 {dimension_numbers = #tpu.dot_dimension_numbers<[1], [0], [0], [1], [0, 0, 1, 1], [], []>} : vector<8x256xbf16>, vector<256x128xbf16>, vector<8x128xf32> -> vector<8x128xf32>
    %c0_20 = arith.constant 0 : index
    %c0_21 = arith.constant 0 : index
    %61 = vector.load %arg9[%c0_20, %c0_21] : memref<1x128xf32, #tpu.memory_space<vmem>>, vector<1x128xf32>
    %62 = vector.broadcast %61 : vector<1x128xf32> to vector<8x128xf32>
    %63 = arith.addf %60, %62 : vector<8x128xf32>
    %c0_22 = arith.constant 0 : index
    %c0_23 = arith.constant 0 : index
    %64 = vector.load %arg10[%c0_22, %c0_23] : memref<8x128xf32, #tpu.memory_space<vmem>>, vector<8x128xf32>
    tpu.vector_store %arg10[%c0_22, %c0_23], %63 {strides = array<i32>} : memref<8x128xf32, #tpu.memory_space<vmem>>, vector<8x128xf32>,
    return
  }
  func.func @transform_0(%arg0: i32) -> (i32, i32) {
    %c0_i32 = arith.constant 0 : i32
    %c0_i32_0 = arith.constant 0 : i32
    return %arg0, %c0_i32 : i32, i32
  }
  func.func @transform_1(%arg0: i32) -> (i32, i32) {
    %c0_i32 = arith.constant 0 : i32
    %c0_i32_0 = arith.constant 0 : i32
    %c0_i32_1 = arith.constant 0 : i32
    return %c0_i32, %c0_i32_0 : i32, i32
  }
  func.func @transform_2(%arg0: i32) -> (i32, i32) {
    %c0_i32 = arith.constant 0 : i32
    %c0_i32_0 = arith.constant 0 : i32
    %c0_i32_1 = arith.constant 0 : i32
    return %c0_i32, %c0_i32_0 : i32, i32
  }
  func.func @transform_3(%arg0: i32) -> (i32, i32) {
    %c0_i32 = arith.constant 0 : i32
    %c0_i32_0 = arith.constant 0 : i32
    %c0_i32_1 = arith.constant 0 : i32
    return %c0_i32, %c0_i32_0 : i32, i32
  }
  func.func @transform_4(%arg0: i32) -> (i32, i32) {
    %c0_i32 = arith.constant 0 : i32
    %c0_i32_0 = arith.constant 0 : i32
    %c0_i32_1 = arith.constant 0 : i32
    return %c0_i32, %c0_i32_0 : i32, i32
  }
  func.func @transform_5(%arg0: i32) -> (i32, i32) {
    %c0_i32 = arith.constant 0 : i32
    %c0_i32_0 = arith.constant 0 : i32
    %c0_i32_1 = arith.constant 0 : i32
    return %c0_i32, %c0_i32_0 : i32, i32
  }
  func.func @transform_6(%arg0: i32) -> (i32, i32) {
    %c0_i32 = arith.constant 0 : i32
    %c0_i32_0 = arith.constant 0 : i32
    %c0_i32_1 = arith.constant 0 : i32
    return %c0_i32, %c0_i32_0 : i32, i32
  }
  func.func @transform_7(%arg0: i32) -> (i32, i32) {
    %c0_i32 = arith.constant 0 : i32
    %c0_i32_0 = arith.constant 0 : i32
    %c0_i32_1 = arith.constant 0 : i32
    return %c0_i32, %c0_i32_0 : i32, i32
  }
  func.func @transform_8(%arg0: i32) -> (i32, i32) {
    %c0_i32 = arith.constant 0 : i32
    %c0_i32_0 = arith.constant 0 : i32
    %c0_i32_1 = arith.constant 0 : i32
    return %c0_i32, %c0_i32_0 : i32, i32
  }
  func.func @transform_9(%arg0: i32) -> (i32, i32) {
    %c0_i32 = arith.constant 0 : i32
    %c0_i32_0 = arith.constant 0 : i32
    return %arg0, %c0_i32 : i32, i32
  }
}

</mosaic_0001>

<bundles_post_ra>
// kernel: tpu_custom_call.1
= control target key start
LH: loop header
LB: loop body
LE: loop exit
PB: predicated region body
PF: predicated region fallthrough
CT: control target
= control target key end

     0   :  { %14 = vsyncpa [#allocation3], 0  ;;  %s1616_s0 = inlined_call_operand.hbm [shape: f32[8,6], index: 0, kind: input, shape index: {}]   ;;  %s1617_s1 = inlined_call_operand.hbm [shape: f32[6,256], index: 1, kind: input, shape index: {}]   ;;  %s1618_s2 = inlined_call_operand.hbm [shape: f32[1,256], index: 2, kind: input, shape index: {}]   ;;  %s1619_s3 = inlined_call_operand.hbm [shape: bf16[256,256], index: 3, kind: input, shape index: {}]   ;;  %s1620_s4 = inlined_call_operand.vmem [shape: f32[1,256], index: 4, kind: input, shape index: {}]   ;;  %s1621_s5 = inlined_call_operand.hbm [shape: bf16[256,256], index: 5, kind: input, shape index: {}]   ;;  %s1622_s6 = inlined_call_operand.vmem [shape: f32[1,256], index: 6, kind: input, shape index: {}]   ;;  %s1623_s7 = inlined_call_operand.hbm [shape: bf16[256,128], index: 7, kind: input, shape index: {}]   ;;  %s1624_s8 = inlined_call_operand.vmem [shape: f32[1,128], index: 8, kind: input, shape index: {}]   ;;  %s1625_s9 = inlined_call_operand.hbm [shape: f32[8,128], index: 9, kind: output, shape index: {}]  }
   0x1   :  { %15 = vsyncpa [#allocation6], 0 }
   0x2   :  { %16 = vsyncpa [#allocation9], 0 }
   0x3   :  { %17 = vsyncpa [#allocation12], 0  ;;  %s35_s11 = sshll.u32 %s1617_s1, 4  ;;  %s36_s11 = int_to_ptr.hbm [resolvable:$true] %s35_s11 }
   0x4   :  { %18 = vsyncpa [#allocation4], 0  ;;  %s1485_s12 = smov [#allocation5]   ;;  %s56_s16 = sshll.u32 %s1619_s3, 4  ;;  %s57_s16 = int_to_ptr.hbm [resolvable:$true] %s56_s16 }
   0x5   :  { %s37_s13 = sshll.u32 %s1485_s12, 4  ;;  %s1486_s17 = smov [#allocation8]   ;;  %s38_s13 = int_to_ptr.vmem [resolvable:$true] %s37_s13 }
   0x6   :  { %40 = dma.hbm_to_vmem [thread:$0]  %s36_s11, 256, %s38_s13, [#allocation6]  }
   0x7   :  { %s58_s18 = sshll.u32 %s1486_s17, 4  ;;  %s1487_s19 = smov 128   ;;  %s59_s18 = int_to_ptr.vmem [resolvable:$true] %s58_s18 }
   0x8   :  { %s1488_s20 = smov 8   ;;  %s24_s1 = sshll.u32 %s1616_s0, 4  ;;  %s25_s1 = int_to_ptr.hbm [resolvable:$true] %s24_s1 }
   0x9   :  { %64 = dma.hbm_to_vmem [thread:$0]  %s57_s16, 4096, %s59_s18, [#allocation9], %s1487_s19, %s1487_s19, %s1488_s20  }
   0xa   :  { %s1489_s23 = smov [#allocation2]   ;;  %s46_s3 = sshll.u32 %s1618_s2, 4  ;;  %s47_s3 = int_to_ptr.hbm [resolvable:$true] %s46_s3 }
   0xb   :  { %s26_s24 = sshll.u32 %s1489_s23, 4  ;;  %s1490_s27 = smov [#allocation7]   ;;  %s27_s24 = int_to_ptr.vmem [resolvable:$true] %s26_s24 }
   0xc   :  { %29 = dma.hbm_to_vmem [thread:$0]  %s25_s1, 128, %s27_s24, [#allocation3]  }
   0xd   :  { %s48_s28 = sshll.u32 %s1490_s27, 4  ;;  %s71_s10 = sshll.u32 %s1621_s5, 4  ;;  %s49_s28 = int_to_ptr.vmem [resolvable:$true] %s48_s28  ;;  %s72_s10 = int_to_ptr.hbm [resolvable:$true] %s71_s10 }
   0xe   :  { %51 = dma.hbm_to_vmem [thread:$0]  %s47_s3, 32, %s49_s28, [#allocation6]  }
   0xf   :  { %s86_s12 = sshll.u32 %s1623_s7, 4  ;;  %s1491_s13 = smov [#allocation10]   ;;  %s87_s12 = int_to_ptr.hbm [resolvable:$true] %s86_s12 }
  0x10   :  { %s73_s14 = sshll.u32 %s1491_s13, 4  ;;  %s1492_s2 = smov [#allocation11]   ;;  %s74_s14 = int_to_ptr.vmem [resolvable:$true] %s73_s14 }
  0x11   :  { %79 = dma.hbm_to_vmem [thread:$0]  %s72_s10, 4096, %s74_s14, [#allocation9], %s1487_s19, %s1487_s19, %s1488_s20  }
  0x12   :  { %s88_s15 = sshll.u32 %s1492_s2, 4  ;;  %s1493_s16 = smov 64   ;;  %s89_s15 = int_to_ptr.vmem [resolvable:$true] %s88_s15 }
  0x13   :  { %s1494_s17 = smov 4  }
  0x14   :  { %94 = dma.hbm_to_vmem [thread:$0]  %s87_s12, 2048, %s89_s15, [#allocation12], %s1493_s16, %s1493_s16, %s1494_s17  }
  0x15   :  { %1475 = dma.done.wait [#allocation3], 128  }
  0x16   :  { %1476 = vsyncadd [#allocation3], 4294967168 }
  0x17   :  { %1477 = dma.done.wait [#allocation6], 288  }
  0x18   :  { %1478 = vsyncadd [#allocation6], 4294967008 }
  0x19   :  { %1479 = dma.done.wait [#allocation9], 8192  }
  0x1a   :  { %1480 = vsyncadd [#allocation9], 4294959104 }
  0x1b   :  { %1481 = dma.done.wait [#allocation12], 2048  }
  0x1c   :  { %1482 = vsyncadd [#allocation12], 4294965248  ;;  %v1495_v0 = vmov 0   ;;  %v1496_v1 = vmov 2   ;;  %v1497_v2 = vmov 4   ;;  %v121_v3 = vld [vmem:[#allocation2] sm:$0xff] }
  0x1d   :  { %1299 = vset.pattern.permute.xlu0 %v1495_v0  ;;  %1301 = vset.pattern.permute.xlu1 %v1496_v1  ;;  %v940_v4 = vld [vmem:[#allocation8 + $0x70] sm:$0xf]  ;;  %v1217_v5 = vld [vmem:[#allocation8 + $0x74] sm:$0xf0]  ;;  %v1216_v9 = vld [vmem:[#allocation8 + $0x74] sm:$0xf] }
  0x1e   :  { %1303 = vset.pattern.permute.xlu2 %v1497_v2  ;;  %127 = vperm.xlu0 %1299, %v121_v3   ;;  %v941_v6 = vor.u32 %v1217_v5, %v940_v4  ;;  %v1004_v7 = vld [vmem:[#allocation8 + $0xf0] sm:$0xf]  ;;  %v1233_v8 = vld [vmem:[#allocation8 + $0xf4] sm:$0xf0]  ;;  %v942_v11 = vld [vmem:[#allocation8 + $0x78] sm:$0xf0] }
  0x1f   :  { %152 = vperm.xlu1 %1301, %v121_v3   ;;  %172 = vperm.xlu2 %1303, %v121_v3   ;;  %v1005_v10 = vor.u32 %v1233_v8, %v1004_v7  ;;  %v1232_v12 = vld [vmem:[#allocation8 + $0xf4] sm:$0xf]  ;;  %v1006_v13 = vld [vmem:[#allocation8 + $0xf8] sm:$0xf0]  ;;  %v945_v14 = vor.u32 %v1216_v9, %v942_v11  ;;  %v932_v16 = vld [vmem:[#allocation8 + $0x60] sm:$0xf] }
  0x20   :  { %393 = vmatpush.bf16.msra.mxu0 %v941_v6  ;;  %v1009_v15 = vor.u32 %v1232_v12, %v1006_v13  ;;  %v1215_v17 = vld [vmem:[#allocation8 + $0x64] sm:$0xf0]  ;;  %v996_v18 = vld [vmem:[#allocation8 + $0xe0] sm:$0xf]  ;;  %v1214_v21 = vld [vmem:[#allocation8 + $0x64] sm:$0xf] }
  0x21   :  { %406 = vmatpush.bf16.msra.mxu1 %v1005_v10  ;;  %v933_v19 = vor.u32 %v1215_v17, %v932_v16  ;;  %v1231_v20 = vld [vmem:[#allocation8 + $0xe4] sm:$0xf0]  ;;  %v934_v22 = vld [vmem:[#allocation8 + $0x68] sm:$0xf0]  ;;  %419 = vmatpush.bf16.msra.mxu2 %v945_v14  ;;  %v1230_v24 = vld [vmem:[#allocation8 + $0xe4] sm:$0xf] }
  0x22   :  { %432 = vmatpush.bf16.msra.mxu3 %v1009_v15  ;;  %v997_v23 = vor.u32 %v1231_v20, %v996_v18  ;;  %v998_v25 = vld [vmem:[#allocation8 + $0xe8] sm:$0xf0]  ;;  %v937_v26 = vor.u32 %v1214_v21, %v934_v22  ;;  %v1498_v28 = vmov 1   ;;  %v1499_v29 = vmov 3   ;;  %v924_v31 = vld [vmem:[#allocation8 + $0x50] sm:$0xf] }
  0x23   :  { %v1001_v27 = vor.u32 %v1230_v24, %v998_v25  ;;  %v1500_v30 = vmov 5   ;;  %v1213_v32 = vld [vmem:[#allocation8 + $0x54] sm:$0xf0]  ;;  %v988_v33 = vld [vmem:[#allocation8 + $0xd0] sm:$0xf]  ;;  %s1501_s20 = smov [#allocation13]  }
  0x24   :  { %394 = vmatpush.bf16.msra.mxu0 %v933_v19  ;;  %v925_v34 = vor.u32 %v1213_v32, %v924_v31  ;;  %v1229_v35 = vld [vmem:[#allocation8 + $0xd4] sm:$0xf0]  ;;  %v1212_v36 = vld [vmem:[#allocation8 + $0x54] sm:$0xf]  ;;  %v926_v37 = vld [vmem:[#allocation8 + $0x58] sm:$0xf0] }
  0x25   :  { %407 = vmatpush.bf16.msra.mxu1 %v997_v23  ;;  %420 = vmatpush.bf16.msra.mxu2 %v937_v26  ;;  %v989_v38 = vor.u32 %v1229_v35, %v988_v33  ;;  %v929_v39 = vor.u32 %v1212_v36, %v926_v37  ;;  %v1228_v40 = vld [vmem:[#allocation8 + $0xd4] sm:$0xf]  ;;  %v990_v41 = vld [vmem:[#allocation8 + $0xd8] sm:$0xf0]  ;;  %v916_v43 = vld [vmem:[#allocation8 + $0x40] sm:$0xf] }
  0x26   :  { %1300 = vset.pattern.permute.xlu0 %v1498_v28  ;;  %433 = vmatpush.bf16.msra.mxu3 %v1001_v27  ;;  %v993_v42 = vor.u32 %v1228_v40, %v990_v41  ;;  %v1211_v44 = vld [vmem:[#allocation8 + $0x44] sm:$0xf0]  ;;  %v980_v46 = vld [vmem:[#allocation8 + $0xc0] sm:$0xf]  ;;  %v1210_v48 = vld [vmem:[#allocation8 + $0x44] sm:$0xf] }
  0x27   :  { %1302 = vset.pattern.permute.xlu1 %v1499_v29  ;;  %142 = vperm.xlu0 %1300, %v121_v3   ;;  %v917_v45 = vor.u32 %v1211_v44, %v916_v43  ;;  %v1227_v47 = vld [vmem:[#allocation8 + $0xc4] sm:$0xf0]  ;;  %v918_v50 = vld [vmem:[#allocation8 + $0x48] sm:$0xf0]  ;;  %v1226_v51 = vld [vmem:[#allocation8 + $0xc4] sm:$0xf] }
  0x28   :  { %162 = vperm.xlu1 %1302, %v121_v3   ;;  %1304 = vset.pattern.permute.xlu2 %v1500_v30  ;;  %v981_v49 = vor.u32 %v1227_v47, %v980_v46  ;;  %v982_v52 = vld [vmem:[#allocation8 + $0xc8] sm:$0xf0]  ;;  %v921_v53 = vor.u32 %v1210_v48, %v918_v50  ;;  %v908_v55 = vld [vmem:[#allocation8 + $0x30] sm:$0xf]  ;;  %v1209_v56 = vld [vmem:[#allocation8 + $0x34] sm:$0xf0] }
  0x29   :  { %182 = vperm.xlu2 %1304, %v121_v3   ;;  %395 = vmatpush.bf16.msra.mxu0 %v925_v34  ;;  %v985_v54 = vor.u32 %v1226_v51, %v982_v52  ;;  %v972_v57 = vld [vmem:[#allocation8 + $0xb0] sm:$0xf]  ;;  %v909_v58 = vor.u32 %v1209_v56, %v908_v55  ;;  %v1225_v59 = vld [vmem:[#allocation8 + $0xb4] sm:$0xf0]  ;;  %v1208_v60 = vld [vmem:[#allocation8 + $0x34] sm:$0xf] }
  0x2a   :  { %408 = vmatpush.bf16.msra.mxu1 %v989_v38  ;;  %421 = vmatpush.bf16.msra.mxu2 %v929_v39  ;;  %v910_v61 = vld [vmem:[#allocation8 + $0x38] sm:$0xf0]  ;;  %v973_v62 = vor.u32 %v1225_v59, %v972_v57  ;;  %v1224_v0 = vld [vmem:[#allocation8 + $0xb4] sm:$0xf]  ;;  %v900_v3 = vld [vmem:[#allocation8 + $0x20] sm:$0xf] }
  0x2b   :  { %434 = vmatpush.bf16.msra.mxu3 %v993_v42  ;;  %v913_v63 = vor.u32 %v1208_v60, %v910_v61  ;;  %v974_v1 = vld [vmem:[#allocation8 + $0xb8] sm:$0xf0]  ;;  %v1207_v4 = vld [vmem:[#allocation8 + $0x24] sm:$0xf0]  ;;  %v964_v6 = vld [vmem:[#allocation8 + $0xa0] sm:$0xf] }
  0x2c   :  { %v977_v2 = vor.u32 %v1224_v0, %v974_v1  ;;  %v901_v5 = vor.u32 %v1207_v4, %v900_v3  ;;  %v1223_v7 = vld [vmem:[#allocation8 + $0xa4] sm:$0xf0]  ;;  %v1206_v8 = vld [vmem:[#allocation8 + $0x24] sm:$0xf]  ;;  %v902_v10 = vld [vmem:[#allocation8 + $0x28] sm:$0xf0] }
  0x2d   :  { %396 = vmatpush.bf16.msra.mxu0 %v917_v45  ;;  %v965_v9 = vor.u32 %v1223_v7, %v964_v6  ;;  %v1222_v11 = vld [vmem:[#allocation8 + $0xa4] sm:$0xf]  ;;  %v966_v12 = vld [vmem:[#allocation8 + $0xa8] sm:$0xf0]  ;;  %v905_v13 = vor.u32 %v1206_v8, %v902_v10  ;;  %v892_v15 = vld [vmem:[#allocation8 + $0x10] sm:$0xf] }
  0x2e   :  { %409 = vmatpush.bf16.msra.mxu1 %v981_v49  ;;  %422 = vmatpush.bf16.msra.mxu2 %v921_v53  ;;  %v969_v14 = vor.u32 %v1222_v11, %v966_v12  ;;  %v1205_v16 = vld [vmem:[#allocation8 + $0x14] sm:$0xf0]  ;;  %v956_v18 = vld [vmem:[#allocation8 + $0x90] sm:$0xf]  ;;  %v1204_v20 = vld [vmem:[#allocation8 + $0x14] sm:$0xf] }
  0x2f   :  { %1305 = vset.pattern.permute.xlu0 %v1500_v30  ;;  %435 = vmatpush.bf16.msra.mxu3 %v985_v54  ;;  %v893_v17 = vor.u32 %v1205_v16, %v892_v15  ;;  %v1221_v19 = vld [vmem:[#allocation8 + $0x94] sm:$0xf0]  ;;  %v894_v22 = vld [vmem:[#allocation8 + $0x18] sm:$0xf0]  ;;  %v1220_v23 = vld [vmem:[#allocation8 + $0x94] sm:$0xf] }
  0x30   :  { %v957_v21 = vor.u32 %v1221_v19, %v956_v18  ;;  %v958_v24 = vld [vmem:[#allocation8 + $0x98] sm:$0xf0]  ;;  %v897_v25 = vor.u32 %v1204_v20, %v894_v22  ;;  %v884_v27 = vld [vmem:[#allocation8] sm:$0xf]  ;;  %v1203_v28 = vld [vmem:[#allocation8 + $0x4] sm:$0xf0] }
  0x31   :  { %397 = vmatpush.bf16.msra.mxu0 %v909_v58  ;;  %v961_v26 = vor.u32 %v1220_v23, %v958_v24  ;;  %v948_v29 = vld [vmem:[#allocation8 + $0x80] sm:$0xf]  ;;  %v885_v30 = vor.u32 %v1203_v28, %v884_v27  ;;  %v1219_v31 = vld [vmem:[#allocation8 + $0x84] sm:$0xf0]  ;;  %v1202_v32 = vld [vmem:[#allocation8 + $0x4] sm:$0xf] }
  0x32   :  { %410 = vmatpush.bf16.msra.mxu1 %v973_v62  ;;  %423 = vmatpush.bf16.msra.mxu2 %v913_v63  ;;  %v886_v33 = vld [vmem:[#allocation8 + $0x8] sm:$0xf0]  ;;  %v949_v34 = vor.u32 %v1219_v31, %v948_v29  ;;  %v1218_v36 = vld [vmem:[#allocation8 + $0x84] sm:$0xf]  ;;  %v1572_v40 = vld [vmem:[#allocation5 + $0x8] sm:$0x3f] }
  0x33   :  { %436 = vmatpush.bf16.msra.mxu3 %v977_v2  ;;  %v889_v35 = vor.u32 %v1202_v32, %v886_v33  ;;  %v950_v37 = vld [vmem:[#allocation8 + $0x88] sm:$0xf0]  ;;  %v1574_v41 = vld [vmem:[#allocation7] sm:$0x3]  ;;  %v131_v43 = vperm.slane %v1572_v40, 0  ;;  %v146_v29 = vperm.slane %v1572_v40, 1 }
  0x34   :  { %v1570_v38 = vld [vmem:[#allocation5] sm:$0x3f]  ;;  %v953_v39 = vor.u32 %v1218_v36, %v950_v37  ;;  %v135_v44 = vperm.slane %v1574_v41, 0  ;;  %v136_v45 = vperm.slane %v1574_v41, 1  ;;  %v1249_v48 = vld [vmem:[#allocation10 + $0x74] sm:$0xf0] }
  0x35   :  { %398 = vmatpush.bf16.msra.mxu0 %v901_v5  ;;  %v130_v42 = vperm.slane %v1570_v38, 0  ;;  %v155_v46 = vperm.slane %v1570_v38, 2  ;;  %v1068_v47 = vld [vmem:[#allocation10 + $0x70] sm:$0xf]  ;;  %v1248_v49 = vld [vmem:[#allocation10 + $0x74] sm:$0xf] }
  0x36   :  { %411 = vmatpush.bf16.msra.mxu1 %v965_v9  ;;  %424 = vmatpush.bf16.msra.mxu2 %v905_v13  ;;  %v1069_v50 = vor.u32 %v1249_v48, %v1068_v47  ;;  %v1070_v51 = vld [vmem:[#allocation10 + $0x78] sm:$0xf0]  ;;  %v1060_v52 = vld [vmem:[#allocation10 + $0x60] sm:$0xf]  ;;  %v1247_v53 = vld [vmem:[#allocation10 + $0x64] sm:$0xf0] }
  0x37   :  { %437 = vmatpush.bf16.msra.mxu3 %v969_v14  ;;  %v1073_v54 = vor.u32 %v1248_v49, %v1070_v51  ;;  %v1246_v55 = vld [vmem:[#allocation10 + $0x64] sm:$0xf]  ;;  %v1062_v56 = vld [vmem:[#allocation10 + $0x68] sm:$0xf0]  ;;  %v1132_v57 = vld [vmem:[#allocation10 + $0xf0] sm:$0xf]  ;;  %v1061_v58 = vor.u32 %v1247_v53, %v1060_v52 }
  0x38   :  { %v1265_v59 = vld [vmem:[#allocation10 + $0xf4] sm:$0xf0]  ;;  %v1264_v60 = vld [vmem:[#allocation10 + $0xf4] sm:$0xf]  ;;  %v1134_v61 = vld [vmem:[#allocation10 + $0xf8] sm:$0xf0]  ;;  %v1065_v62 = vor.u32 %v1246_v55, %v1062_v56 }
  0x39   :  { %399 = vmatpush.bf16.msra.mxu0 %v893_v17  ;;  %v1133_v63 = vor.u32 %v1265_v59, %v1132_v57  ;;  %v1137_v0 = vor.u32 %v1264_v60, %v1134_v61  ;;  %v1052_v1 = vld [vmem:[#allocation10 + $0x50] sm:$0xf]  ;;  %v1245_v2 = vld [vmem:[#allocation10 + $0x54] sm:$0xf0]  ;;  %v1244_v3 = vld [vmem:[#allocation10 + $0x54] sm:$0xf] }
  0x3a   :  { %412 = vmatpush.bf16.msra.mxu1 %v957_v21  ;;  %425 = vmatpush.bf16.msra.mxu2 %v897_v25  ;;  %v1054_v6 = vld [vmem:[#allocation10 + $0x58] sm:$0xf0]  ;;  %v1124_v7 = vld [vmem:[#allocation10 + $0xe0] sm:$0xf]  ;;  %v1263_v8 = vld [vmem:[#allocation10 + $0xe4] sm:$0xf0]  ;;  %v1053_v14 = vor.u32 %v1245_v2, %v1052_v1 }
  0x3b   :  { %438 = vmatpush.bf16.msra.mxu3 %v961_v26  ;;  %v156_v9 = vperm.slane %v1572_v40, 2  ;;  %v175_v10 = vperm.slane %v1570_v38, 4  ;;  %v1262_v11 = vld [vmem:[#allocation10 + $0xe4] sm:$0xf]  ;;  %v1126_v12 = vld [vmem:[#allocation10 + $0xe8] sm:$0xf0]  ;;  %v1125_v15 = vor.u32 %v1263_v8, %v1124_v7  ;;  %v1057_v20 = vor.u32 %v1244_v3, %v1054_v6 }
  0x3c   :  { %v176_v13 = vperm.slane %v1572_v40, 4  ;;  %v1129_v16 = vor.u32 %v1262_v11, %v1126_v12  ;;  %v1044_v17 = vld [vmem:[#allocation10 + $0x40] sm:$0xf]  ;;  %v1243_v18 = vld [vmem:[#allocation10 + $0x44] sm:$0xf0]  ;;  %v145_v28 = vperm.slane %v1570_v38, 1 }
  0x3d   :  { %400 = vmatpush.bf16.msra.mxu0 %v885_v30  ;;  %v1242_v21 = vld [vmem:[#allocation10 + $0x44] sm:$0xf]  ;;  %v1116_v22 = vld [vmem:[#allocation10 + $0xd0] sm:$0xf]  ;;  %v1261_v23 = vld [vmem:[#allocation10 + $0xd4] sm:$0xf0] }
  0x3e   :  { %413 = vmatpush.bf16.msra.mxu1 %v949_v34  ;;  %426 = vmatpush.bf16.msra.mxu2 %v889_v35  ;;  %v1046_v24 = vld [vmem:[#allocation10 + $0x48] sm:$0xf0]  ;;  %v1260_v25 = vld [vmem:[#allocation10 + $0xd4] sm:$0xf]  ;;  %v1118_v26 = vld [vmem:[#allocation10 + $0xd8] sm:$0xf0]  ;;  %v1117_v30 = vor.u32 %v1261_v23, %v1116_v22  ;;  %v1045_v34 = vor.u32 %v1243_v18, %v1044_v17 }
  0x3f   :  { %439 = vmatpush.bf16.msra.mxu3 %v953_v39  ;;  %v165_v32 = vperm.slane %v1570_v38, 3  ;;  %v166_v33 = vperm.slane %v1572_v40, 3  ;;  %v1108_v35 = vld [vmem:[#allocation10 + $0xc0] sm:$0xf]  ;;  %v1259_v36 = vld [vmem:[#allocation10 + $0xc4] sm:$0xf0]  ;;  %v1049_v37 = vor.u32 %v1242_v21, %v1046_v24  ;;  %v1121_v39 = vor.u32 %v1260_v25, %v1118_v26 }
  0x40   :  { %v1241_v47 = vld [vmem:[#allocation10 + $0x34] sm:$0xf0]  ;;  %v1240_v48 = vld [vmem:[#allocation10 + $0x34] sm:$0xf]  ;;  %v1038_v49 = vld [vmem:[#allocation10 + $0x38] sm:$0xf0]  ;;  %v1109_v56 = vor.u32 %v1259_v36, %v1108_v35 }
  0x41   :  { %647 = vmatpush.bf16.msrb.mxu0 %v1069_v50  ;;  %v1258_v50 = vld [vmem:[#allocation10 + $0xc4] sm:$0xf]  ;;  %v1110_v51 = vld [vmem:[#allocation10 + $0xc8] sm:$0xf0]  ;;  %v185_v55 = vperm.slane %v1570_v38, 5  ;;  %s867_s21 = sshll.u32 %s1501_s20, 4  ;;  %s868_s21 = int_to_ptr.vmem [resolvable:$true] %s867_s21 }
  0x42   :  { %673 = vmatpush.bf16.msrb.mxu2 %v1073_v54  ;;  %660 = vmatpush.bf16.msrb.mxu1 %v1133_v63  ;;  %v1028_v63 = vld [vmem:[#allocation10 + $0x20] sm:$0xf]  ;;  %v1238_v6 = vld [vmem:[#allocation10 + $0x24] sm:$0xf]  ;;  %v1030_v41 = vld [vmem:[#allocation10 + $0x28] sm:$0xf0] }
  0x43   :  { %686 = vmatpush.bf16.msrb.mxu3 %v1137_v0  ;;  %v1239_v0 = vld [vmem:[#allocation10 + $0x24] sm:$0xf0]  ;;  %v1033_v12 = vor.u32 %v1238_v6, %v1030_v41  ;;  %v1102_v26 = vld [vmem:[#allocation10 + $0xb8] sm:$0xf0]  ;;  %v1254_v36 = vld [vmem:[#allocation10 + $0xa4] sm:$0xf] }
  0x44   :  { %v1255_v35 = vld [vmem:[#allocation10 + $0xa4] sm:$0xf0]  ;;  %v1270_v6 = vld [vmem:[#allocation11 + $0x20] sm:$0xff]  ;;  %s869_s23 = sshll.u32 %s1625_s9, 4  ;;  %s870_s23 = int_to_ptr.hbm [resolvable:$true] %s869_s23 }
  0x45   :  { %648 = vmatpush.bf16.msrb.mxu0 %v1061_v58 }
  0x46   :  { %674 = vmatpush.bf16.msrb.mxu2 %v1065_v62  ;;  %661 = vmatpush.bf16.msrb.mxu1 %v1125_v15  ;;  %v186_v62 = vperm.slane %v1572_v40, 5  ;;  %v1100_v40 = vld [vmem:[#allocation10 + $0xb0] sm:$0xf] }
  0x47   :  { %687 = vmatpush.bf16.msrb.mxu3 %v1129_v16 }
  0x49   :  { %649 = vmatpush.bf16.msrb.mxu0 %v1053_v14 }
  0x4a   :  { %675 = vmatpush.bf16.msrb.mxu2 %v1057_v20  ;;  %662 = vmatpush.bf16.msrb.mxu1 %v1117_v30  ;;  %v1236_v30 = vld [vmem:[#allocation10 + $0x14] sm:$0xf] }
  0x4b   :  { %688 = vmatpush.bf16.msrb.mxu3 %v1121_v39  ;;  %v1094_v39 = vld [vmem:[#allocation10 + $0xa8] sm:$0xf0] }
  0x4d   :  { %650 = vmatpush.bf16.msrb.mxu0 %v1045_v34  ;;  %v1092_v34 = vld [vmem:[#allocation10 + $0xa0] sm:$0xf] }
  0x4e   :  { %676 = vmatpush.bf16.msrb.mxu2 %v1049_v37  ;;  %663 = vmatpush.bf16.msrb.mxu1 %v1109_v56  ;;  %v1093_v37 = vor.u32 %v1255_v35, %v1092_v34  ;;  %v1086_v56 = vld [vmem:[#allocation10 + $0x98] sm:$0xf0] }
  0x79   :  { %v1584_v19 = vpop.permute.xlu2 %172 }
  0x7a   :  { %v178_v11 = vmul.f32 %v176_v13, %v1584_v19  ;;  %v1257_v13 = vld [vmem:[#allocation10 + $0xb4] sm:$0xf0] }
  0x7b   :  { %v1101_v25 = vor.u32 %v1257_v13, %v1100_v40  ;;  %v1268_v40 = vld [vmem:[#allocation11 + $0x10] sm:$0xff]  ;;  %v1277_v13 = vld [vmem:[#allocation11 + $0x58] sm:$0xff] }
  0x7d   :  { %664 = vmatpush.bf16.msrb.mxu1 %v1101_v25  ;;  %v1276_v25 = vld [vmem:[#allocation11 + $0x50] sm:$0xff] }
  0x81   :  { %665 = vmatpush.bf16.msrb.mxu1 %v1093_v37 }
  0x90   :  { %v128_v4 = vpop.permute.xlu0 %127 }
  0x91   :  { %v153_v5 = vpop.permute.xlu1 %152  ;;  %v132_v27 = vmul.f32 %v130_v42, %v128_v4  ;;  %v133_v31 = vmul.f32 %v131_v43, %v128_v4  ;;  %v1036_v42 = vld [vmem:[#allocation10 + $0x30] sm:$0xf] }
  0x92   :  { %v157_v52 = vmul.f32 %v155_v46, %v153_v5  ;;  %v1037_v60 = vor.u32 %v1241_v47, %v1036_v42  ;;  %v158_v61 = vmul.f32 %v156_v9, %v153_v5  ;;  %v1113_v46 = vor.u32 %v1258_v50, %v1110_v51  ;;  %v1012_v47 = vld [vmem:[#allocation10] sm:$0xf]  ;;  %v1014_v51 = vld [vmem:[#allocation10 + $0x8] sm:$0xf0] }
  0x93   :  { %v139_v43 = vadd.f32 %v135_v44, %v132_v27  ;;  %v140_v57 = vadd.f32 %v136_v45, %v133_v31  ;;  %v1041_v44 = vor.u32 %v1240_v48, %v1038_v49  ;;  %v183_v45 = vpop.permute.xlu2 %182  ;;  %v1029_v5 = vor.u32 %v1239_v0, %v1028_v63  ;;  %v1235_v48 = vld [vmem:[#allocation10 + $0x4] sm:$0xf0]  ;;  %v1234_v49 = vld [vmem:[#allocation10 + $0x4] sm:$0xf]  ;;  %v1281_v63 = vld [vmem:[#allocation11 + $0x78] sm:$0xff] }
  0x94   :  { %651 = vmatpush.bf16.msrb.mxu0 %v1037_v60  ;;  %v177_v9 = vmul.f32 %v175_v10, %v1584_v19  ;;  %689 = vmatpush.bf16.msrb.mxu3 %v1113_v46  ;;  %v187_v16 = vmul.f32 %v185_v55, %v183_v45  ;;  %v188_v17 = vmul.f32 %v186_v62, %v183_v45  ;;  %v1256_v19 = vld [vmem:[#allocation10 + $0xb4] sm:$0xf]  ;;  %v1250_v60 = vld [vmem:[#allocation10 + $0x84] sm:$0xf]  ;;  %v1078_v62 = vld [vmem:[#allocation10 + $0x88] sm:$0xf0] }
  0x95   :  { %677 = vmatpush.bf16.msrb.mxu2 %v1041_v44  ;;  %v1105_v27 = vor.u32 %v1256_v19, %v1102_v26  ;;  %v1097_v42 = vor.u32 %v1254_v36, %v1094_v39  ;;  %v1013_v50 = vor.u32 %v1235_v48, %v1012_v47  ;;  %v1252_v55 = vld [vmem:[#allocation10 + $0x94] sm:$0xf]  ;;  %v1081_v44 = vor.u32 %v1250_v60, %v1078_v62  ;;  %v1273_v46 = vld [vmem:[#allocation11 + $0x38] sm:$0xff]  ;;  %v1267_v19 = vld [vmem:[#allocation11 + $0x8] sm:$0xff] }
  0x96   :  { %v1272_v0 = vld [vmem:[#allocation11 + $0x30] sm:$0xff]  ;;  %v1269_v45 = vld [vmem:[#allocation11 + $0x18] sm:$0xff]  ;;  %v1266_v26 = vld [vmem:[#allocation11] sm:$0xff] }
  0x98   :  { %652 = vmatpush.bf16.msrb.mxu0 %v1029_v5  ;;  %690 = vmatpush.bf16.msrb.mxu3 %v1105_v27  ;;  %v1275_v27 = vld [vmem:[#allocation11 + $0x48] sm:$0xff] }
  0x99   :  { %v143_v53 = vpop.permute.xlu0 %142  ;;  %678 = vmatpush.bf16.msrb.mxu2 %v1033_v12 }
  0x9a   :  { %v163_v54 = vpop.permute.xlu1 %162  ;;  %v147_v58 = vmul.f32 %v145_v28, %v143_v53  ;;  %v148_v59 = vmul.f32 %v146_v29, %v143_v53  ;;  %v1020_v28 = vld [vmem:[#allocation10 + $0x10] sm:$0xf]  ;;  %v1237_v29 = vld [vmem:[#allocation10 + $0x14] sm:$0xf0] }
  0x9b   :  { %v167_v3 = vmul.f32 %v165_v32, %v163_v54  ;;  %v168_v4 = vmul.f32 %v166_v33, %v163_v54  ;;  %v1021_v31 = vor.u32 %v1237_v29, %v1020_v28  ;;  %v1022_v32 = vld [vmem:[#allocation10 + $0x18] sm:$0xf0]  ;;  %v1253_v53 = vld [vmem:[#allocation10 + $0x94] sm:$0xf0]  ;;  %v1274_v28 = vld [vmem:[#allocation11 + $0x40] sm:$0xff] }
  0x9c   :  { %v149_v1 = vadd.f32 %v147_v58, %v139_v43  ;;  %v150_v2 = vadd.f32 %v148_v59, %v140_v57  ;;  %v1025_v33 = vor.u32 %v1236_v30, %v1022_v32  ;;  %691 = vmatpush.bf16.msrb.mxu3 %v1097_v42  ;;  %v1017_v43 = vor.u32 %v1234_v49, %v1014_v51  ;;  %v1076_v58 = vld [vmem:[#allocation10 + $0x80] sm:$0xf]  ;;  %v1251_v59 = vld [vmem:[#allocation10 + $0x84] sm:$0xf0]  ;;  %v481_v29 = vld [vmem:[%s1622_s6] sm:$0x3] }
  0x9d   :  { %653 = vmatpush.bf16.msrb.mxu0 %v1021_v31  ;;  %v1089_v57 = vor.u32 %v1252_v55, %v1086_v56  ;;  %v483_v31 = vperm.slane %v481_v29, 0  ;;  %v484_v36 = vperm.slane %v481_v29, 1  ;;  %v1306_v55 = vld [vmem:[%s1624_s8] ss:$0 sm:$0xff] }
  0x9e   :  { %v159_v7 = vadd.f32 %v157_v52, %v149_v1  ;;  %v160_v8 = vadd.f32 %v158_v61, %v150_v2  ;;  %679 = vmatpush.bf16.msrb.mxu2 %v1025_v33  ;;  %v1084_v52 = vld [vmem:[#allocation10 + $0x90] sm:$0xf]  ;;  %v1077_v61 = vor.u32 %v1251_v59, %v1076_v58  ;;  %v1271_v2 = vld [vmem:[#allocation11 + $0x28] sm:$0xff] }
  0x9f   :  { %v1085_v54 = vor.u32 %v1253_v53, %v1084_v52  ;;  %v1280_v1 = vld [vmem:[#allocation11 + $0x70] sm:$0xff] }
  0xa0   :  { %v169_v14 = vadd.f32 %v167_v3, %v159_v7  ;;  %v170_v15 = vadd.f32 %v168_v4, %v160_v8  ;;  %692 = vmatpush.bf16.msrb.mxu3 %v1089_v57  ;;  %v1279_v3 = vld [vmem:[#allocation11 + $0x68] sm:$0xff]  ;;  %v227_v4 = vld [vmem:[%s1620_s4] sm:$0x3] }
  0xa1   :  { %654 = vmatpush.bf16.msrb.mxu0 %v1013_v50  ;;  %666 = vmatpush.bf16.msrb.mxu1 %v1085_v54  ;;  %v229_v41 = vperm.slane %v227_v4, 0 }
  0xa2   :  { %v179_v18 = vadd.f32 %v177_v9, %v169_v14  ;;  %v180_v20 = vadd.f32 %v178_v11, %v170_v15  ;;  %680 = vmatpush.bf16.msrb.mxu2 %v1017_v43  ;;  %v230_v11 = vperm.slane %v227_v4, 1 }
  0xa4   :  { %v189_v21 = vadd.f32 %v187_v16, %v179_v18  ;;  %v190_v22 = vadd.f32 %v188_v17, %v180_v20  ;;  %693 = vmatpush.bf16.msrb.mxu3 %v1081_v44 }
  0xa5   :  { %667 = vmatpush.bf16.msrb.mxu1 %v1077_v61 }
  0xa6   :  { %v191_v23 = vmax.f32 %v189_v21, 0.0  ;;  %v192_v38 = vmax.f32 %v190_v22, 0.0 }
  0xa8   :  { %v193_v10 = vpack.c.bf16 %v191_v23, %v191_v23  ;;  %v194_v24 = vpack.c.bf16 %v192_v38, %v192_v38 }
  0xaa   :  { %401 = vmatmul.bf16.vlgmr.msra.gmra.mxu0 %v193_v10  ;;  %414 = vmatmul.bf16.vlgmr.msra.gmra.mxu1 %v194_v24 }
  0xab   :  { %427 = vmatmul.bf16.vlgmr.msra.gmra.mxu2 %v193_v10  ;;  %440 = vmatmul.bf16.vlgmr.msra.gmra.mxu3 %v194_v24  ;;  %v1278_v24 = vld [vmem:[#allocation11 + $0x60] sm:$0xff] }
  0xac   :  { %835 = vmatpush.bf16.msra.mxu0 %v1273_v46  ;;  %848 = vmatpush.bf16.msra.mxu1 %v1281_v63 }
  0xb0   :  { %836 = vmatpush.bf16.msra.mxu0 %v1272_v0  ;;  %849 = vmatpush.bf16.msra.mxu1 %v1280_v1 }
  0xb4   :  { %837 = vmatpush.bf16.msra.mxu0 %v1271_v2  ;;  %850 = vmatpush.bf16.msra.mxu1 %v1279_v3 }
  0xb8   :  { %838 = vmatpush.bf16.msra.mxu0 %v1270_v6  ;;  %851 = vmatpush.bf16.msra.mxu1 %v1278_v24 }
  0xbc   :  { %839 = vmatpush.bf16.msra.mxu0 %v1269_v45  ;;  %852 = vmatpush.bf16.msra.mxu1 %v1277_v13 }
  0xc0   :  { %840 = vmatpush.bf16.msra.mxu0 %v1268_v40  ;;  %853 = vmatpush.bf16.msra.mxu1 %v1276_v25 }
  0xc4   :  { %841 = vmatpush.bf16.msra.mxu0 %v1267_v19  ;;  %854 = vmatpush.bf16.msra.mxu1 %v1275_v27 }
  0xc8   :  { %842 = vmatpush.bf16.msra.mxu0 %v1266_v26  ;;  %855 = vmatpush.bf16.msra.mxu1 %v1274_v28 }
 0x127   :  { %v402_v7 = vpop.f32.mrf.mxu0  ;;  %v415_v8 = vpop.f32.mrf.mxu1 }
 0x128   :  { %v403_v5 = vadd.f32 %v402_v7, %v229_v41 }
 0x12a   :  { %v416_v9 = vadd.f32 %v415_v8, %v403_v5 }
 0x12c   :  { %v445_v12 = vmax.f32 %v416_v9, 0.0 }
 0x12e   :  { %v447_v14 = vpack.c.bf16 %v445_v12, %v445_v12  ;;  %v428_v15 = vpop.f32.mrf.mxu2  ;;  %v441_v16 = vpop.f32.mrf.mxu3 }
 0x12f   :  { %v429_v17 = vadd.f32 %v428_v15, %v230_v11  ;;  %v404_v18 = vpop.f32.mrf.mxu0  ;;  %v417_v20 = vpop.f32.mrf.mxu1 }
 0x130   :  { %655 = vmatmul.bf16.vlgmr.msrb.gmra.mxu0 %v447_v14  ;;  %681 = vmatmul.bf16.vlgmr.msrb.gmra.mxu2 %v447_v14 }
 0x131   :  { %v442_v21 = vadd.f32 %v441_v16, %v429_v17 }
 0x133   :  { %v446_v22 = vmax.f32 %v442_v21, 0.0 }
 0x135   :  { %v448_v23 = vpack.c.bf16 %v446_v22, %v446_v22 }
 0x136   :  { %v430_v38 = vpop.f32.mrf.mxu2  ;;  %v443_v10 = vpop.f32.mrf.mxu3 }
 0x137   :  { %668 = vmatmul.bf16.vlgmr.msrb.gmra.mxu1 %v448_v23  ;;  %694 = vmatmul.bf16.vlgmr.msrb.gmra.mxu3 %v448_v23 }
 0x1ad   :  { %v656_v30 = vpop.f32.mrf.mxu0 }
 0x1ae   :  { %v657_v32 = vadd.f32 %v656_v30, %v483_v31 }
 0x1b3   :  { %v682_v33 = vpop.f32.mrf.mxu2 }
 0x1b4   :  { %v669_v34 = vpop.f32.mrf.mxu1  ;;  %v683_v47 = vadd.f32 %v682_v33, %v484_v36 }
 0x1b5   :  { %v670_v35 = vadd.f32 %v669_v34, %v657_v32  ;;  %v658_v37 = vpop.f32.mrf.mxu0 }
 0x1b7   :  { %v699_v39 = vmax.f32 %v670_v35, 0.0 }
 0x1b9   :  { %v701_v42 = vpack.c.bf16 %v699_v39, %v699_v39 }
 0x1ba   :  { %v695_v48 = vpop.f32.mrf.mxu3 }
 0x1bb   :  { %v696_v49 = vadd.f32 %v695_v48, %v683_v47  ;;  %843 = vmatmul.bf16.vlgmr.msra.gmra.mxu0 %v701_v42  ;;  %v684_v50 = vpop.f32.mrf.mxu2 }
 0x1bc   :  { %v671_v51 = vpop.f32.mrf.mxu1 }
 0x1bd   :  { %v700_v43 = vmax.f32 %v696_v49, 0.0 }
 0x1bf   :  { %v702_v52 = vpack.c.bf16 %v700_v43, %v700_v43 }
 0x1c1   :  { %856 = vmatmul.bf16.vlgmr.msra.gmra.mxu1 %v702_v52 }
 0x1c2   :  { %v697_v53 = vpop.f32.mrf.mxu3 }
 0x238   :  { %v844_v54 = vpop.f32.mrf.mxu0 }
 0x239   :  { %v845_v56 = vadd.f32 %v1306_v55, %v844_v54 }
 0x23e   :  { %v857_v57 = vpop.f32.mrf.mxu1 }
 0x23f   :  { %v858_v58 = vadd.f32 %v857_v57, %v845_v56 }
 0x240   :  { %v846_v59 = vpop.f32.mrf.mxu0 }
 0x241   :  { %861 = vst [vmem:[#allocation13] sm:$0xff] %v858_v58 }
 0x242   :  { %872 = dma.vmem_to_hbm [thread:$0]  %s868_s21, 128, %s870_s23, [#allocation4]  }
 0x246   :  { %v859_v60 = vpop.f32.mrf.mxu1 }
 0x247   :  { %1483 = dma.done.wait [#allocation4], 128  }
 0x248   :  { %1484 = vsyncadd [#allocation4], 4294967168 }
 0x249   :  { %877 = vsyncpa [#allocation3], 1 }
 0x24a   :  { %878 = vsyncpa [#allocation6], 1 }
 0x24b   :  { %879 = vsyncpa [#allocation9], 1 }
 0x24c   :  { %880 = vsyncpa [#allocation12], 1 }
 0x24d   :  { %881 = vsyncpa [#allocation4], 1 }

</bundles_post_ra>
